<compile_context>
chip_gen: v7x
topology: tpu7x:2x2x1
jax: 0.10.0
libtpu: 0.0.40
codegen_flags: <defaults>
</compile_context>

<pallas_src>
import jax
import jax.numpy as jnp
from jax.experimental import pallas as pl
from jax.experimental.pallas import tpu as pltpu

ACTION_NUM = 2
HIDDEN = 16
DEFAULT_TB = 2048  # batch tile (rows); multiple of 8, safe on v5e/v6e/v7x


def _disc_kernel(s_ref, a_ref, ws_ref, wa_ref, b1_ref, w2_ref, b2_ref,
                 w3_ref, b3_ref, o_ref):
    # s_ref: (TB, D) f32 state tile; a_ref: (TB, 1) int32 raw action indices.
    s = s_ref[...]
    a = a_ref[...].astype(jnp.float32) * (1.0 / ACTION_NUM)        # (TB, 1)

    # fc1 with the concat fused: x @ W1 == s @ W1[:D] + a * W1[D]
    h1 = jnp.dot(s, ws_ref[...], preferred_element_type=jnp.float32)
    h1 = h1 + a * wa_ref[...] + b1_ref[...]
    h1 = jnp.maximum(h1, 0.0)                                      # relu

    h2 = jnp.dot(h1, w2_ref[...], preferred_element_type=jnp.float32) + b2_ref[...]
    h2 = jnp.maximum(h2, 0.0)                                      # relu

    logit = jnp.dot(h2, w3_ref[...], preferred_element_type=jnp.float32) + b3_ref[...]
    o_ref[...] = jax.nn.sigmoid(logit)                             # (TB, 1)


def _round_up(x, m):
    return (x + m - 1) // m * m


def discriminator_forward(state, action, params, *, tb=DEFAULT_TB):
    """state: (B, state_dim) f32, action: (B,) int -> (B, 1) f32."""
    ws, wa, b1, w2, b2, w3, b3 = params
    B, D = state.shape
    a = action.reshape(-1, 1)                    # (B, 1) int (metadata only)

    tb = min(tb, _round_up(B, 8))                # batch tile, multiple of 8
    grid = (pl.cdiv(B, tb),)                     # last block may be partial;
                                                 # OOB writes are masked.
    resident = lambda i: (0, 0)                  # weights/biases stay put

    out = pl.pallas_call(
        _disc_kernel,
        out_shape=jax.ShapeDtypeStruct((B, 1), jnp.float32),
        grid=grid,
        in_specs=[
            pl.BlockSpec((tb, D), lambda i: (i, 0)),       # state tile
            pl.BlockSpec((tb, 1), lambda i: (i, 0)),       # action tile
            pl.BlockSpec((D, HIDDEN), resident),           # W1[:D]
            pl.BlockSpec((1, HIDDEN), resident),           # W1[D] (action row)
            pl.BlockSpec((1, HIDDEN), resident),           # b1
            pl.BlockSpec((HIDDEN, HIDDEN), resident),      # W2
            pl.BlockSpec((1, HIDDEN), resident),           # b2
            pl.BlockSpec((HIDDEN, 1), resident),           # W3
            pl.BlockSpec((1, 1), resident),                # b3
        ],
        out_specs=pl.BlockSpec((tb, 1), lambda i: (i, 0)),
        compiler_params=pltpu.CompilerParams(
            dimension_semantics=("parallel",)),            # both TCs on v7x
    )(state, a, ws, wa, b1, w2, b2, w3, b3)
    return out


def init_params(key, state_dim):
    """Synthetic init mimicking nn.Linear's U(-1/sqrt(fan_in), 1/sqrt(fan_in)).

    Weights are stored pre-transposed as (in_features, out_features); W1 is
    pre-split into a state part (D, 16) and an action row (1, 16) so the
    kernel can fuse the concat. Biases are (1, out) for clean broadcasting.
    """
    def linear(k, fan_in, fan_out):
        kw, kb = jax.random.split(k)
        bound = 1.0 / jnp.sqrt(fan_in)
        w = jax.random.uniform(kw, (fan_in, fan_out), jnp.float32, -bound, bound)
        b = jax.random.uniform(kb, (1, fan_out), jnp.float32, -bound, bound)
        return w, b

    k1, k2, k3 = jax.random.split(key, 3)
    w1, b1 = linear(k1, state_dim + 1, HIDDEN)
    ws, wa = w1[:state_dim, :], w1[state_dim:state_dim + 1, :]
    w2, b2 = linear(k2, HIDDEN, HIDDEN)
    w3, b3 = linear(k3, HIDDEN, 1)
    return (ws, wa, b1, w2, b2, w3, b3)


def _reference_forward(state, action, params):
    """Pure-JAX reference matching the PyTorch module exactly (concat form)."""
    ws, wa, b1, w2, b2, w3, b3 = params
    w1 = jnp.concatenate([ws, wa], axis=0)
    a = (action.astype(state.dtype) / ACTION_NUM).reshape(-1, 1)
    x = jnp.concatenate([state, a], axis=1)
    h1 = jnp.maximum(x @ w1 + b1, 0.0)
    h2 = jnp.maximum(h1 @ w2 + b2, 0.0)
    return jax.nn.sigmoid(h2 @ w3 + b3)


if __name__ == "__main__":
    key = jax.random.PRNGKey(0)
    k_state, k_action, k_params = jax.random.split(key, 3)

    batch = 8
    state_dim = 4

    state = jax.random.normal(k_state, (batch, state_dim), dtype=jnp.float32)
    action = jax.random.randint(k_action, (batch,), 0, ACTION_NUM, dtype=jnp.int32)
    params = init_params(k_params, state_dim)

    out = discriminator_forward(state, action, params)
    out = jax.block_until_ready(out)
    ref = _reference_forward(state, action, params)
    assert out.shape == (batch, 1), out.shape
    assert jnp.allclose(out, ref, atol=1e-5, rtol=1e-5), (out, ref)

    # Second case: batch not a multiple of the tile -> exercises grid > 1 and
    # the masked (out-of-bounds) last tile path, with no padding copy.
    k_s2, k_a2 = jax.random.split(jax.random.PRNGKey(1))
    batch2 = 50
    state2 = jax.random.normal(k_s2, (batch2, state_dim), dtype=jnp.float32)
    action2 = jax.random.randint(k_a2, (batch2,), 0, ACTION_NUM, dtype=jnp.int32)
    out2 = jax.block_until_ready(
        discriminator_forward(state2, action2, params, tb=16))
    ref2 = _reference_forward(state2, action2, params)
    assert out2.shape == (batch2, 1), out2.shape
    assert jnp.allclose(out2, ref2, atol=1e-5, rtol=1e-5), (out2, ref2)

    print("KERNEL_OK")
</pallas_src>

<mosaic_0001>
module attributes {stable_mosaic.version = 11 : i64} {
  func.func @_disc_kernel(%arg0: i32, %arg1: memref<8x4xf32, #tpu.memory_space<vmem>>, %arg2: memref<8x1xi32, #tpu.memory_space<vmem>>, %arg3: memref<4x16xf32, #tpu.memory_space<vmem>>, %arg4: memref<1x16xf32, #tpu.memory_space<vmem>>, %arg5: memref<1x16xf32, #tpu.memory_space<vmem>>, %arg6: memref<16x16xf32, #tpu.memory_space<vmem>>, %arg7: memref<1x16xf32, #tpu.memory_space<vmem>>, %arg8: memref<16x1xf32, #tpu.memory_space<vmem>>, %arg9: memref<1x1xf32, #tpu.memory_space<vmem>>, %arg10: memref<8x1xf32, #tpu.memory_space<vmem>>) attributes {dimension_semantics = [#tpu.dimension_semantics<parallel>], iteration_bounds = array<i64: 1>, scalar_prefetch = 0 : i64, scratch_operands = 0 : i64, tpu.core_type = #tpu.core_type<tc>, window_params = [{transform_indices = @transform_0, window_bounds = array<i64: 8, 4>}, {transform_indices = @transform_1, window_bounds = array<i64: 8, 1>}, {pipeline_mode = #tpu.pipeline_mode<synchronous>, transform_indices = @transform_2, window_bounds = array<i64: 4, 16>}, {pipeline_mode = #tpu.pipeline_mode<synchronous>, transform_indices = @transform_3, window_bounds = array<i64: 1, 16>}, {pipeline_mode = #tpu.pipeline_mode<synchronous>, transform_indices = @transform_4, window_bounds = array<i64: 1, 16>}, {pipeline_mode = #tpu.pipeline_mode<synchronous>, transform_indices = @transform_5, window_bounds = array<i64: 16, 16>}, {pipeline_mode = #tpu.pipeline_mode<synchronous>, transform_indices = @transform_6, window_bounds = array<i64: 1, 16>}, {pipeline_mode = #tpu.pipeline_mode<synchronous>, transform_indices = @transform_7, window_bounds = array<i64: 16, 1>}, {pipeline_mode = #tpu.pipeline_mode<synchronous>, transform_indices = @transform_8, window_bounds = array<i64: 1, 1>}, {transform_indices = @transform_9, window_bounds = array<i64: 8, 1>}]} {
    %c0 = arith.constant 0 : index
    %c0_0 = arith.constant 0 : index
    %0 = vector.load %arg1[%c0, %c0_0] : memref<8x4xf32, #tpu.memory_space<vmem>>, vector<8x4xf32>
    %c0_1 = arith.constant 0 : index
    %c0_2 = arith.constant 0 : index
    %1 = vector.load %arg2[%c0_1, %c0_2] : memref<8x1xi32, #tpu.memory_space<vmem>>, vector<8x1xi32>
    %2 = arith.sitofp %1 : vector<8x1xi32> to vector<8x1xf32>
    %cst = arith.constant 5.000000e-01 : f32
    %3 = vector.broadcast %cst : f32 to vector<8x1xf32>
    %4 = arith.mulf %2, %3 : vector<8x1xf32>
    %c0_3 = arith.constant 0 : index
    %c0_4 = arith.constant 0 : index
    %5 = vector.load %arg3[%c0_3, %c0_4] : memref<4x16xf32, #tpu.memory_space<vmem>>, vector<4x16xf32>
    %cst_5 = arith.constant dense<0.000000e+00> : vector<8x16xf32>
    %6 = tpu.matmul %0, %5, %cst_5 {dimension_numbers = #tpu.dot_dimension_numbers<[1], [0], [0], [1], [0, 0, 1, 1], [], []>} : vector<8x4xf32>, vector<4x16xf32>, vector<8x16xf32> -> vector<8x16xf32>
    %c0_6 = arith.constant 0 : index
    %c0_7 = arith.constant 0 : index
    %7 = vector.load %arg4[%c0_6, %c0_7] : memref<1x16xf32, #tpu.memory_space<vmem>>, vector<1x16xf32>
    %8 = vector.broadcast %4 : vector<8x1xf32> to vector<8x16xf32>
    %9 = vector.broadcast %7 : vector<1x16xf32> to vector<8x16xf32>
    %10 = arith.mulf %8, %9 : vector<8x16xf32>
    %11 = arith.addf %6, %10 : vector<8x16xf32>
    %c0_8 = arith.constant 0 : index
    %c0_9 = arith.constant 0 : index
    %12 = vector.load %arg5[%c0_8, %c0_9] : memref<1x16xf32, #tpu.memory_space<vmem>>, vector<1x16xf32>
    %13 = vector.broadcast %12 : vector<1x16xf32> to vector<8x16xf32>
    %14 = arith.addf %11, %13 : vector<8x16xf32>
    %cst_10 = arith.constant 0.000000e+00 : f32
    %15 = vector.broadcast %cst_10 : f32 to vector<8x16xf32>
    %16 = arith.maximumf %14, %15 : vector<8x16xf32>
    %c0_11 = arith.constant 0 : index
    %c0_12 = arith.constant 0 : index
    %17 = vector.load %arg6[%c0_11, %c0_12] : memref<16x16xf32, #tpu.memory_space<vmem>>, vector<16x16xf32>
    %cst_13 = arith.constant dense<0.000000e+00> : vector<8x16xf32>
    %18 = tpu.matmul %16, %17, %cst_13 {dimension_numbers = #tpu.dot_dimension_numbers<[1], [0], [0], [1], [0, 0, 1, 1], [], []>} : vector<8x16xf32>, vector<16x16xf32>, vector<8x16xf32> -> vector<8x16xf32>
    %c0_14 = arith.constant 0 : index
    %c0_15 = arith.constant 0 : index
    %19 = vector.load %arg7[%c0_14, %c0_15] : memref<1x16xf32, #tpu.memory_space<vmem>>, vector<1x16xf32>
    %20 = vector.broadcast %19 : vector<1x16xf32> to vector<8x16xf32>
    %21 = arith.addf %18, %20 : vector<8x16xf32>
    %cst_16 = arith.constant 0.000000e+00 : f32
    %22 = vector.broadcast %cst_16 : f32 to vector<8x16xf32>
    %23 = arith.maximumf %21, %22 : vector<8x16xf32>
    %c0_17 = arith.constant 0 : index
    %c0_18 = arith.constant 0 : index
    %24 = vector.load %arg8[%c0_17, %c0_18] : memref<16x1xf32, #tpu.memory_space<vmem>>, vector<16x1xf32>
    %cst_19 = arith.constant dense<0.000000e+00> : vector<8x1xf32>
    %25 = tpu.matmul %23, %24, %cst_19 {dimension_numbers = #tpu.dot_dimension_numbers<[1], [0], [0], [1], [0, 0, 1, 1], [], []>} : vector<8x16xf32>, vector<16x1xf32>, vector<8x1xf32> -> vector<8x1xf32>
    %c0_20 = arith.constant 0 : index
    %c0_21 = arith.constant 0 : index
    %26 = vector.load %arg9[%c0_20, %c0_21] : memref<1x1xf32, #tpu.memory_space<vmem>>, vector<1x1xf32>
    %27 = vector.broadcast %26 : vector<1x1xf32> to vector<8x1xf32>
    %28 = arith.addf %25, %27 : vector<8x1xf32>
    %29 = arith.negf %28 : vector<8x1xf32>
    %30 = math.exp %29 : vector<8x1xf32>
    %cst_22 = arith.constant 1.000000e+00 : f32
    %31 = vector.broadcast %cst_22 : f32 to vector<8x1xf32>
    %32 = arith.addf %31, %30 : vector<8x1xf32>
    %33 = arith.divf %31, %32 : vector<8x1xf32>
    %c0_23 = arith.constant 0 : index
    %c0_24 = arith.constant 0 : index
    %34 = vector.load %arg10[%c0_23, %c0_24] : memref<8x1xf32, #tpu.memory_space<vmem>>, vector<8x1xf32>
    tpu.vector_store %arg10[%c0_23, %c0_24], %33 {strides = array<i32>} : memref<8x1xf32, #tpu.memory_space<vmem>>, vector<8x1xf32>,
    return
  }
  func.func @transform_0(%arg0: i32) -> (i32, i32) {
    %c0_i32 = arith.constant 0 : i32
    %c0_i32_0 = arith.constant 0 : i32
    return %arg0, %c0_i32 : i32, i32
  }
  func.func @transform_1(%arg0: i32) -> (i32, i32) {
    %c0_i32 = arith.constant 0 : i32
    %c0_i32_0 = arith.constant 0 : i32
    return %arg0, %c0_i32 : i32, i32
  }
  func.func @transform_2(%arg0: i32) -> (i32, i32) {
    %c0_i32 = arith.constant 0 : i32
    %c0_i32_0 = arith.constant 0 : i32
    %c0_i32_1 = arith.constant 0 : i32
    return %c0_i32, %c0_i32_0 : i32, i32
  }
  func.func @transform_3(%arg0: i32) -> (i32, i32) {
    %c0_i32 = arith.constant 0 : i32
    %c0_i32_0 = arith.constant 0 : i32
    %c0_i32_1 = arith.constant 0 : i32
    return %c0_i32, %c0_i32_0 : i32, i32
  }
  func.func @transform_4(%arg0: i32) -> (i32, i32) {
    %c0_i32 = arith.constant 0 : i32
    %c0_i32_0 = arith.constant 0 : i32
    %c0_i32_1 = arith.constant 0 : i32
    return %c0_i32, %c0_i32_0 : i32, i32
  }
  func.func @transform_5(%arg0: i32) -> (i32, i32) {
    %c0_i32 = arith.constant 0 : i32
    %c0_i32_0 = arith.constant 0 : i32
    %c0_i32_1 = arith.constant 0 : i32
    return %c0_i32, %c0_i32_0 : i32, i32
  }
  func.func @transform_6(%arg0: i32) -> (i32, i32) {
    %c0_i32 = arith.constant 0 : i32
    %c0_i32_0 = arith.constant 0 : i32
    %c0_i32_1 = arith.constant 0 : i32
    return %c0_i32, %c0_i32_0 : i32, i32
  }
  func.func @transform_7(%arg0: i32) -> (i32, i32) {
    %c0_i32 = arith.constant 0 : i32
    %c0_i32_0 = arith.constant 0 : i32
    %c0_i32_1 = arith.constant 0 : i32
    return %c0_i32, %c0_i32_0 : i32, i32
  }
  func.func @transform_8(%arg0: i32) -> (i32, i32) {
    %c0_i32 = arith.constant 0 : i32
    %c0_i32_0 = arith.constant 0 : i32
    %c0_i32_1 = arith.constant 0 : i32
    return %c0_i32, %c0_i32_0 : i32, i32
  }
  func.func @transform_9(%arg0: i32) -> (i32, i32) {
    %c0_i32 = arith.constant 0 : i32
    %c0_i32_0 = arith.constant 0 : i32
    return %arg0, %c0_i32 : i32, i32
  }
}

</mosaic_0001>

<bundles_post_ra>
// kernel: tpu_custom_call.1
= control target key start
LH: loop header
LB: loop body
LE: loop exit
PB: predicated region body
PF: predicated region fallthrough
CT: control target
= control target key end

     0   :  { %vm56_vm0 = vcmask 1043456   ;;  %vm52_vm1 = vcmask 31744   ;;  %v368_v0 = vmov 0.0   ;;  %vm369_vm2 = vmmov 0   ;;  %s460_s2 = inlined_call_operand.vmem [shape: f32[4,16], index: 2, kind: input, shape index: {}]   ;;  %s461_s0 = inlined_call_operand.vmem [shape: f32[8,4], index: 0, kind: input, shape index: {}]   ;;  %s462_s1 = inlined_call_operand.vmem [shape: s32[8,1], index: 1, kind: input, shape index: {}]   ;;  %s463_s5 = inlined_call_operand.vmem [shape: f32[16,16], index: 5, kind: input, shape index: {}]   ;;  %s464_s3 = inlined_call_operand.vmem [shape: f32[1,16], index: 3, kind: input, shape index: {}]   ;;  %s465_s4 = inlined_call_operand.vmem [shape: f32[1,16], index: 4, kind: input, shape index: {}]   ;;  %s466_s7 = inlined_call_operand.vmem [shape: f32[16,1], index: 7, kind: input, shape index: {}]   ;;  %s467_s8 = inlined_call_operand.<no memory space> [shape: f32[1,1], index: 8, kind: input, shape index: {}]   ;;  %s468_s6 = inlined_call_operand.vmem [shape: f32[1,16], index: 6, kind: input, shape index: {}]   ;;  %s469_s9 = inlined_call_operand.vmem [shape: f32[8,1], index: 9, kind: output, shape index: {}]  }
   0x1   :  { %334 = vmatprep.subr.mxu0 %v368_v0  ;;  %v38_v1 = vld [vmem:[%s460_s2] sm:$0xf]  ;;  %336 = vmatprep.mubr.msk.f32.mxu0 %vm369_vm2, %v368_v0  ;;  %v370_v4 = vmov 0   ;;  %v140_v8 = vld [vmem:[%s463_s5 + $0x8] sm:$0xff]  ;;  %v371_v10 = vmov 0.0|0.0   ;;  %vm148_vm3 = vcmask 130048   ;;  %v14_v23 = vstv %s467_s8 }
   0x2   :  { %v34_v2 = vld [vmem:[%s461_s0] sm:$0xff]  ;;  %335 = vmatpush3.msk.msra.mxu0 %vm56_vm0, %v38_v1  ;;  %363 = vset.pattern.permute.xlu0 %v370_v4  ;;  %v224_v21 = vld [vmem:[%s466_s7 + $0x8] sm:$0xff]  ;;  %15 = vst [vmem:[#allocation2] sm:$0x1] %v14_v23  ;;  %vm311_vm4 = vcmask 7168  }
   0x3   :  { %v35_v3 = vld [vmem:[%s462_s1] sm:$0xff]  ;;  %337 = vmatmul.mubr.msk.f32.vlgmr.msra.gmra.mrb[0].mxu0 %vm52_vm1, %v34_v2  ;;  %343 = vmatprep.mubr.msk.f32.mxu1 %vm369_vm2, %v368_v0 }
   0x4   :  { %v36_v5 = vcvt.s32.f32 %v35_v3  ;;  %350 = vmatprep.mubr.msk.f32.mxu0 %vm369_vm2, %v368_v0  ;;  %v139_v7 = vld [vmem:[%s463_s5] sm:$0xff]  ;;  %353 = vmatprep.subr.bf16.mxu1 %v371_v10 }
   0x5   :  { %v354_v9 = vpack.c.bf16 %v140_v8, %v139_v7  ;;  %356 = vmatprep.subr.bf16.mxu0 %v371_v10  ;;  %v317_v11 = vld [vmem:[%s464_s3] ss:$0 sm:$0xff] }
   0x6   :  { %v37_v6 = vmul.f32 0.5, %v36_v5  ;;  %v320_v15 = vld [vmem:[%s465_s4] ss:$0 sm:$0xff] }
   0x7   :  { %355 = vmatpush3.bf16.msra.mxu1 %v354_v9  ;;  %v223_v20 = vld [vmem:[%s466_s7] sm:$0xff] }
   0x8   :  { %42 = vperm.xlu0 %363, %v37_v6   ;;  %v357_v22 = vpack.c.bf16 %v224_v21, %v223_v20  ;;  %v321_v24 = vld [vmem:[%s468_s6] ss:$0 sm:$0xff] }
   0x9   :  { %v323_v29 = vld [vmem:[#allocation2] ss:$0 sm:$0xff] }
   0xa   :  { %358 = vmatpush3.bf16.msra.mxu0 %v357_v22 }
  0x87   :  { %v43_v12 = vpop.permute.xlu0 %42 }
  0x88   :  { %v51_v13 = vmul.f32 %v317_v11, %v43_v12 }
  0xd6   :  { %v126_v14 = vpop.f32.mrb[0].mxu0 }
  0xd7   :  { %v127_v16 = vadd.f32 %v126_v14, %v51_v13  ;;  %v338_v17 = vpop.f32.mrb[1].mxu0 }
  0xd9   :  { %v137_v18 = vadd.f32 %v320_v15, %v127_v16 }
  0xdb   :  { %v138_v19 = vmax.f32 %v137_v18, 0.0 }
  0xdd   :  { %344 = vmatmul.mubr.msk.f32.vlgmr.msra.gmra.mrb[0].mxu1 %vm148_vm3, %v138_v19 }
 0x1b0   :  { %v218_v25 = vpop.f32.mrb[0].mxu1 }
 0x1b1   :  { %v219_v26 = vadd.f32 %v321_v24, %v218_v25  ;;  %v345_v27 = vpop.f32.mrb[1].mxu1 }
 0x1b3   :  { %v222_v28 = vmax.f32 %v219_v26, 0.0 }
 0x1b5   :  { %351 = vmatmul.mubr.msk.f32.vlgmr.msra.gmra.mrb[2].mxu0 %vm148_vm3, %v222_v28 }
 0x288   :  { %v301_v30 = vpop.f32.mrb[2].mxu0 }
 0x289   :  { %v302_v31 = vadd.f32 %v323_v29, %v301_v30  ;;  %v352_v32 = vpop.f32.mrb[3].mxu0 }
 0x28b   :  { %v325_v33 = vmul.f32 -1.442695, %v302_v31 }
 0x28d   :  { %364 = vpow2.f32 %v325_v33 }
 0x297   :  { %v365_v34 = vpop.eup %364 }
 0x298   :  { %v308_v35 = vadd.f32 1.0, %v365_v34 }
 0x29a   :  { %366 = vrcp.f32 %v308_v35 }
 0x2a4   :  { %v367_v36 = vpop.eup %366 }
 0x2a5   :  { %312 = vst.msk [vmem:[%s469_s9] sm:$0xff] %vm311_vm4, %v367_v36 }

</bundles_post_ra>
